<compile_context>
chip_gen: v7x
topology: tpu7x:2x2x1
jax: 0.10.0
libtpu: 0.0.40
codegen_flags: <defaults>
</compile_context>

<pallas_src>
import functools

import jax
import jax.numpy as jnp
from jax.experimental import pallas as pl
from jax.experimental.pallas import tpu as pltpu


# ---------------------------------------------------------------------------
# helpers
# ---------------------------------------------------------------------------
_SINGLE_BLOCK_BYTES = 12 << 20            # operand budget for the 1-block path
_TM_CAP, _TN_CAP, _TK_CAP = 256, 512, 1024  # tile caps (f32), v5e/v6e/v7x safe
_VMEM_CAP_BYTES = 40 << 20                # headroom under v7x 64 MiB physical


def _round_up(x: int, m: int) -> int:
    return ((x + m - 1) // m) * m


def _choose_tile(dim: int, cap: int, align: int):
    """Pick (tile, padded_dim): largest tile <= cap (multiple of `align`) that
    minimizes round_up(dim, tile).  Pads the dim instead of shrinking the tile
    (avoids e.g. 896 collapsing the tile to 128 and multiplying grid steps)."""
    dim = _round_up(max(dim, align), align)
    cap = max(align, (min(cap, dim) // align) * align)
    best_t, best_total = align, dim
    t = cap
    while t >= align:
        total = _round_up(dim, t)
        if total < best_total or (total == best_total and t > best_t):
            best_t, best_total = t, total
        t -= align
    return best_t, best_total


# ---------------------------------------------------------------------------
# kernels
# ---------------------------------------------------------------------------
def _single_block_kernel(z_ref, w_ref, b_ref, o_ref):
    # Whole (sub)problem in one tile: no K loop, no scratch, no pl.when.
    acc = jnp.dot(z_ref[...], w_ref[...], preferred_element_type=jnp.float32)
    o_ref[...] = (acc + b_ref[...].astype(jnp.float32)).astype(o_ref.dtype)


def _tiled_kernel_k1(z_ref, w_ref, b_ref, o_ref):
    # Tiled over (M, N) with a single K chunk: write the tile directly.
    acc = jnp.dot(z_ref[...], w_ref[...], preferred_element_type=jnp.float32)
    o_ref[...] = (acc + b_ref[...].astype(jnp.float32)).astype(o_ref.dtype)


def _tiled_kernel_f32(z_ref, w_ref, b_ref, o_ref):
    # grid_k > 1, f32 output: accumulate directly into the resident output tile
    # (saves the tm x tn f32 scratch and the final acc -> o copy).
    k = pl.program_id(2)

    @pl.when(k == 0)
    def _init():
        # Fold the bias add into the accumulator init.
        o_ref[...] = jnp.broadcast_to(b_ref[...].astype(jnp.float32),
                                      o_ref.shape)

    o_ref[...] += jnp.dot(z_ref[...], w_ref[...],
                          preferred_element_type=jnp.float32)


def _tiled_kernel_acc(z_ref, w_ref, b_ref, o_ref, acc_ref):
    # grid_k > 1, low-precision output: f32 VMEM scratch accumulator.
    k = pl.program_id(2)

    @pl.when(k == 0)
    def _init():
        acc_ref[...] = jnp.broadcast_to(b_ref[...].astype(jnp.float32),
                                        acc_ref.shape)

    acc_ref[...] += jnp.dot(z_ref[...], w_ref[...],
                            preferred_element_type=jnp.float32)

    @pl.when(k == pl.num_programs(2) - 1)
    def _store():
        o_ref[...] = acc_ref[...].astype(o_ref.dtype)


# ---------------------------------------------------------------------------
# parameter prep (done ONCE, not per forward call)
# ---------------------------------------------------------------------------
def init_dynamics_params(weight, bias, *, weight_dtype=None):
    """One-time parameter prep for Dynamics.forward (out = z @ W.T + b).

    weight: [H_out, H_in] (torch nn.Linear layout), bias: [H_out].
    Transposes the weight once.  For large hidden sizes the transposed weight
    is zero-padded up to multiples of the K/N tiles chosen here.  Set
    `weight_dtype=jnp.bfloat16` to halve HBM weight traffic on the
    weight-streaming-bound large-H path (accumulation stays f32) -- a
    precision trade-off, off by default.

    Returns (w_t, b2d, cfg) where cfg holds only static Python config.
    """
    H_out, H_in = weight.shape
    w_dt = weight.dtype if weight_dtype is None else weight_dtype
    w_item = jnp.dtype(w_dt).itemsize

    w_t = weight.T.astype(w_dt)                    # [H_in, H_out]
    b2d = bias.reshape(1, H_out)

    # Small weight -> keep it UNPADDED; forward() runs the single-block fast
    # path (or an M-only tiled path for big batches), so nothing to tile here.
    if H_in * H_out * w_item <= (_SINGLE_BLOCK_BYTES // 2):
        cfg = dict(mode="small", dims=(H_in, H_out))
        return w_t, b2d, cfg

    # Large weight: choose K/N tiles first, then pad the weight to multiples.
    tk, Kp = _choose_tile(H_in, _TK_CAP, 128)
    Np0 = _round_up(H_out, 128)
    # Keep >=2 N-tiles when possible so the "parallel" N axis can be split
    # across v7x's two TensorCores (the M grid is 1 for small batches).
    cap_n = _TN_CAP if Np0 < 256 else max(128, min(_TN_CAP, (Np0 // 2) // 128 * 128))
    tn, Np = _choose_tile(H_out, cap_n, 128)

    w_pad = jnp.zeros((Kp, Np), w_dt).at[:H_in, :H_out].set(w_t)
    b_pad = jnp.zeros((1, Np), bias.dtype).at[0, :H_out].set(bias)
    cfg = dict(mode="tiled", dims=(H_in, H_out), tiles=(tk, tn), padded=(Kp, Np))
    return w_pad, b_pad, cfg


# ---------------------------------------------------------------------------
# forward
# ---------------------------------------------------------------------------
def dynamics_forward(z, w_t, b2d, cfg):
    """out = z @ W.T + b using the prepared params from init_dynamics_params."""
    H_in, H_out = cfg["dims"]
    B = z.shape[0]
    itemsize = jnp.dtype(z.dtype).itemsize
    w_item = jnp.dtype(w_t.dtype).itemsize

    if cfg["mode"] == "small":
        operand_bytes = ((B * H_in + B * H_out) * itemsize
                         + (H_in * H_out + H_out) * w_item)

        # ---- single-block fast path (the production size: H~32, B~8) -------
        if operand_bytes <= _SINGLE_BLOCK_BYTES:
            cost = pl.CostEstimate(flops=2 * B * H_in * H_out,
                                   transcendentals=0,
                                   bytes_accessed=operand_bytes)
            vmem_limit = int(min(max(4 * operand_bytes, 4 << 20),
                                 _VMEM_CAP_BYTES))
            return pl.pallas_call(
                _single_block_kernel,
                out_shape=jax.ShapeDtypeStruct((B, H_out), z.dtype),
                in_specs=[pl.BlockSpec(memory_space=pltpu.MemorySpace.VMEM)] * 3,
                out_specs=pl.BlockSpec(memory_space=pltpu.MemorySpace.VMEM),
                compiler_params=pltpu.CompilerParams(
                    vmem_limit_bytes=vmem_limit),
                cost_estimate=cost,
            )(z, w_t, b2d)

        # ---- small weight, large batch: tile over M only --------------------
        tm, Bp = _choose_tile(B, _TM_CAP, 8)
        z_in = z if Bp == B else jnp.zeros((Bp, H_in), z.dtype).at[:B, :].set(z)
        needed = (2 * tm * (H_in + H_out) * itemsize
                  + (H_in * H_out + H_out) * w_item)
        vmem_limit = int(min(max(2 * needed, 8 << 20), _VMEM_CAP_BYTES))
        cost = pl.CostEstimate(flops=2 * Bp * H_in * H_out, transcendentals=0,
                               bytes_accessed=(Bp * (H_in + H_out)) * itemsize
                               + (H_in * H_out + H_out) * w_item)
        out_p = pl.pallas_call(
            _single_block_kernel,
            out_shape=jax.ShapeDtypeStruct((Bp, H_out), z.dtype),
            grid=(Bp // tm,),
            in_specs=[
                pl.BlockSpec((tm, H_in), lambda i: (i, 0)),      # z rows
                pl.BlockSpec((H_in, H_out), lambda i: (0, 0)),   # weight (resident)
                pl.BlockSpec((1, H_out), lambda i: (0, 0)),      # bias (resident)
            ],
            out_specs=pl.BlockSpec((tm, H_out), lambda i: (i, 0)),
            compiler_params=pltpu.CompilerParams(
                dimension_semantics=("parallel",),
                vmem_limit_bytes=vmem_limit),
            cost_estimate=cost,
        )(z_in, w_t, b2d)
        return out_p if Bp == B else out_p[:B]

    # -------------------- tiled path (large hidden sizes) --------------------
    Kp, Np = cfg["padded"]
    tk, tn = cfg["tiles"]
    tm, Bp = _choose_tile(B, _TM_CAP, 8)

    # Pad z only when actually needed (skip the extra HBM round-trip otherwise).
    if (Bp, Kp) == (B, H_in):
        z_in = z
    else:
        z_in = jnp.zeros((Bp, Kp), z.dtype).at[:B, :H_in].set(z)

    grid = (Bp // tm, Np // tn, Kp // tk)
    grid_k = grid[2]

    # VMEM budget from the chosen tiles: double-buffered inputs/outputs plus
    # (worst case) the f32 scratch, with headroom under v7x's 64 MiB VMEM.
    needed = (2 * (tm * tk * itemsize + tk * tn * w_item + tn * itemsize)
              + 2 * tm * tn * itemsize + tm * tn * 4)
    vmem_limit = int(min(max(2 * needed, 16 << 20), _VMEM_CAP_BYTES))

    cost = pl.CostEstimate(
        flops=2 * Bp * Kp * Np,
        transcendentals=0,
        bytes_accessed=(Bp * Kp + Bp * Np) * itemsize
        + (Kp * Np + Np) * w_item,
    )

    common = dict(
        out_shape=jax.ShapeDtypeStruct((Bp, Np), z.dtype),
        grid=grid,
        in_specs=[
            pl.BlockSpec((tm, tk), lambda i, j, k: (i, k)),   # z
            pl.BlockSpec((tk, tn), lambda i, j, k: (k, j)),   # W.T (padded)
            pl.BlockSpec((1, tn), lambda i, j, k: (0, j)),    # bias
        ],
        out_specs=pl.BlockSpec((tm, tn), lambda i, j, k: (i, j)),
        compiler_params=pltpu.CompilerParams(
            dimension_semantics=("parallel", "parallel", "arbitrary"),
            vmem_limit_bytes=vmem_limit),
        cost_estimate=cost,
    )

    if grid_k == 1:
        out_p = pl.pallas_call(_tiled_kernel_k1, **common)(z_in, w_t, b2d)
    elif z.dtype == jnp.float32:
        out_p = pl.pallas_call(_tiled_kernel_f32, **common)(z_in, w_t, b2d)
    else:
        out_p = pl.pallas_call(
            _tiled_kernel_acc,
            scratch_shapes=[pltpu.VMEM((tm, tn), jnp.float32)],
            **common,
        )(z_in, w_t, b2d)

    if (Bp, Np) == (B, H_out):
        return out_p
    return out_p[:B, :H_out]


def dynamics_reference(z, weight, bias):
    # pure-JAX reference matching torch.nn.Linear: z @ W.T + b
    return z @ weight.T + bias


# ---------------------------------------------------------------------------
# demo / correctness check
# ---------------------------------------------------------------------------
if __name__ == "__main__":
    hidden_size = 32   # hp.hidden_size (small synthetic size)
    batch = 8

    key = jax.random.PRNGKey(0)
    k_z, k_w, k_b = jax.random.split(key, 3)

    z = jax.random.normal(k_z, (batch, hidden_size), dtype=jnp.float32)
    # deterministic synthetic parameters in torch nn.Linear layout
    weight = jax.random.normal(k_w, (hidden_size, hidden_size), dtype=jnp.float32) * 0.1
    bias = jax.random.normal(k_b, (hidden_size,), dtype=jnp.float32) * 0.1

    # one-time parameter prep (transpose hoisted out of the forward path)
    w_t, b2d, cfg = init_dynamics_params(weight, bias)

    fwd = jax.jit(functools.partial(dynamics_forward, cfg=cfg))
    out = jax.block_until_ready(fwd(z, w_t, b2d))

    ref = dynamics_reference(z, weight, bias)
    assert out.shape == (batch, hidden_size)
    assert jnp.allclose(out, ref, atol=1e-5, rtol=1e-5), "mismatch vs reference"

    print("KERNEL_OK")
</pallas_src>

<mosaic_0001>
module attributes {stable_mosaic.version = 11 : i64} {
  func.func @_single_block_kernel(%arg0: memref<8x32xf32, #tpu.memory_space<vmem>>, %arg1: memref<32x32xf32, #tpu.memory_space<vmem>>, %arg2: memref<1x32xf32, #tpu.memory_space<vmem>>, %arg3: memref<8x32xf32, #tpu.memory_space<vmem>>) attributes {dimension_semantics = [], scalar_prefetch = 0 : i64, scratch_operands = 0 : i64, tpu.core_type = #tpu.core_type<tc>} {
    %c0 = arith.constant 0 : index
    %c0_0 = arith.constant 0 : index
    %0 = vector.load %arg0[%c0, %c0_0] : memref<8x32xf32, #tpu.memory_space<vmem>>, vector<8x32xf32>
    %c0_1 = arith.constant 0 : index
    %c0_2 = arith.constant 0 : index
    %1 = vector.load %arg1[%c0_1, %c0_2] : memref<32x32xf32, #tpu.memory_space<vmem>>, vector<32x32xf32>
    %cst = arith.constant dense<0.000000e+00> : vector<8x32xf32>
    %2 = tpu.matmul %0, %1, %cst {dimension_numbers = #tpu.dot_dimension_numbers<[1], [0], [0], [1], [0, 0, 1, 1], [], []>} : vector<8x32xf32>, vector<32x32xf32>, vector<8x32xf32> -> vector<8x32xf32>
    %c0_3 = arith.constant 0 : index
    %c0_4 = arith.constant 0 : index
    %3 = vector.load %arg2[%c0_3, %c0_4] : memref<1x32xf32, #tpu.memory_space<vmem>>, vector<1x32xf32>
    %4 = vector.broadcast %3 : vector<1x32xf32> to vector<8x32xf32>
    %5 = arith.addf %2, %4 : vector<8x32xf32>
    %c0_5 = arith.constant 0 : index
    %c0_6 = arith.constant 0 : index
    %6 = vector.load %arg3[%c0_5, %c0_6] : memref<8x32xf32, #tpu.memory_space<vmem>>, vector<8x32xf32>
    tpu.vector_store %arg3[%c0_5, %c0_6], %5 {strides = array<i32>} : memref<8x32xf32, #tpu.memory_space<vmem>>, vector<8x32xf32>,
    return
  }
}

</mosaic_0001>

<bundles_post_ra>
// kernel: dynamics_forward.1
= control target key start
LH: loop header
LB: loop body
LE: loop exit
PB: predicated region body
PF: predicated region fallthrough
CT: control target
= control target key end

     0   :  { %8 = vsyncpa [#allocation3], 0  ;;  %s322_s0 = inlined_call_operand.hbm [shape: f32[8,32], index: 0, kind: input, shape index: {}]   ;;  %s323_s1 = inlined_call_operand.hbm [shape: f32[32,32], index: 1, kind: input, shape index: {}]   ;;  %s324_s2 = inlined_call_operand.vmem [shape: f32[1,32], index: 2, kind: input, shape index: {}]   ;;  %s325_s3 = inlined_call_operand.hbm [shape: f32[8,32], index: 3, kind: output, shape index: {}]  }
   0x1   :  { %9 = vsyncpa [#allocation6], 0 }
   0x2   :  { %10 = vsyncpa [#allocation4], 0  ;;  %s248_s12 = smov [#allocation2]   ;;  %s249_s14 = smov [#allocation5]  }
   0x3   :  { %s17_s13 = sshll.u32 %s248_s12, 4  ;;  %s26_s15 = sshll.u32 %s249_s14, 4  ;;  %s18_s13 = int_to_ptr.vmem [resolvable:$true] %s17_s13  ;;  %s276_s15 = int_to_ptr.vmem [resolvable:$true] %s26_s15 }
   0x4   :  { %s176_s18 = scalar_lea.hbm %s322_s0, 128 }
   0x5   :  { %p177_p0 = scmp.ne.s32.totalorder %s322_s0, %s176_s18  ;;  %p180_p1 = scmp.lt.u32.totalorder %s176_s18, %s322_s0 }
   0x7   :  { %p182_p2 = pnand %p180_p1, %p177_p0 }
   0x9   :  { %185 = shalt.err (!%p182_p2)
}
   0xa   :  { %s186_s23 = scalar_lea.vmem %s18_s13, 128  ;;  %p191_p4 = scmp.lt.s32.totalorder %s18_s13, %s18_s13 }
   0xb   :  { %p187_p3 = scmp.ne.s32.totalorder %s18_s13, %s186_s23  ;;  %p192_p5 = scmp.lt.s32.totalorder %s186_s23, %s186_s23 }
   0xd   :  { %p193_p6 = por %p192_p5, %p191_p4 }
   0xf   :  { %p194_p7 = pnand %p193_p6, %p187_p3 }
  0x11   :  { %197 = shalt.err (!%p194_p7)
}
  0x12   :  { %20 = dma.hbm_to_vmem [thread:$0]  %s322_s0, 128, %s18_s13, [#allocation3]  }
  0x13   :  { %s198_s28 = scalar_lea.hbm %s323_s1, 512 }
  0x14   :  { %p199_p8 = scmp.ne.s32.totalorder %s323_s1, %s198_s28  ;;  %p202_p9 = scmp.lt.u32.totalorder %s198_s28, %s323_s1 }
  0x16   :  { %p204_p10 = pnand %p202_p9, %p199_p8 }
  0x18   :  { %207 = shalt.err (!%p204_p10)
}
  0x19   :  { %s208_s6 = scalar_lea.vmem %s276_s15, 512  ;;  %p213_p12 = scmp.lt.s32.totalorder %s276_s15, %s276_s15 }
  0x1a   :  { %p209_p11 = scmp.ne.s32.totalorder %s276_s15, %s208_s6  ;;  %p214_p13 = scmp.lt.s32.totalorder %s208_s6, %s208_s6 }
  0x1c   :  { %p215_p0 = por %p214_p13, %p213_p12 }
  0x1e   :  { %p216_p1 = pnand %p215_p0, %p209_p11 }
  0x20   :  { %219 = shalt.err (!%p216_p1)
}
  0x21   :  { %s250_s0 = smov 128   ;;  %s251_s7 = smov 8  }
  0x22   :  { %32 = dma.hbm_to_vmem [thread:$0]  %s323_s1, 512, %s276_s15, [#allocation6], %s250_s0, %s250_s0, %s251_s7  }
  0x23   :  { %242 = dma.done.wait [#allocation3], 128  }
  0x24   :  { %243 = vsyncadd [#allocation3], 4294967168 }
  0x25   :  { %244 = dma.done.wait [#allocation6], 512  }
  0x26   :  { %245 = vsyncadd [#allocation6], 4294966784  ;;  %v252_v0 = vmov 0.0|0.0   ;;  %vm253_vm0 = vmmov 0   ;;  %v254_v1 = vmov 0.0   ;;  %v42_v2 = vld [vmem:[#allocation5] sm:$0xff] }
  0x27   :  { %162 = vmatprep.subr.bf16.mxu0 %v252_v0  ;;  %159 = vmatprep.mubr.msk.f32.mxu0 %vm253_vm0, %v254_v1  ;;  %v43_v3 = vld [vmem:[#allocation5 + $0x8] sm:$0xff]  ;;  %v44_v4 = vld [vmem:[#allocation5 + $0x10] sm:$0xff]  ;;  %v45_v6 = vld [vmem:[#allocation5 + $0x18] sm:$0xff]  ;;  %vm53_vm1 = vcmask 261120   ;;  %s255_s11 = smov [#allocation7]  }
  0x28   :  { %v163_v5 = vpack.c.bf16 %v43_v3, %v42_v2  ;;  %v166_v7 = vpack.c.bf16 %v45_v6, %v44_v4  ;;  %v41_v8 = vld [vmem:[#allocation2] sm:$0xff]  ;;  %s134_s12 = sshll.u32 %s255_s11, 4  ;;  %s135_s12 = int_to_ptr.vmem [resolvable:$true] %s134_s12 }
  0x29   :  { %v144_v9 = vld [vmem:[%s324_s2] ss:$0 sm:$0xff]  ;;  %s220_s13 = scalar_lea.vmem %s135_s12, 128  ;;  %p225_p3 = scmp.lt.s32.totalorder %s135_s12, %s135_s12 }
  0x2a   :  { %164 = vmatpush3.bf16.msra.mxu0 %v163_v5  ;;  %p221_p2 = scmp.ne.s32.totalorder %s135_s12, %s220_s13  ;;  %p226_p4 = scmp.lt.s32.totalorder %s220_s13, %s220_s13 }
  0x2b   :  { %165 = vmatprep.subr.bf16.mxu0 %v252_v0 }
  0x2c   :  { %p227_p5 = por %p226_p4, %p225_p3 }
  0x2e   :  { %167 = vmatpush3.bf16.msra.mxu0 %v166_v7  ;;  %p228_p6 = pnand %p227_p5, %p221_p2 }
  0x31   :  { %160 = vmatmul.mubr.msk.f32.vlgmr.msra.gmra.mrb[0].mxu0 %vm53_vm1, %v41_v8 }
 0x104   :  { %v123_v10 = vpop.f32.mrb[0].mxu0 }
 0x105   :  { %v124_v11 = vadd.f32 %v144_v9, %v123_v10  ;;  %v161_v12 = vpop.f32.mrb[1].mxu0 }
 0x107   :  { %127 = vst.msk [vmem:[#allocation7] sm:$0xff] %vm53_vm1, %v124_v11 }
 0x108   :  { %231 = shalt.err (!%p228_p6)
}
 0x109   :  { %s232_s16 = scalar_lea.hbm %s325_s3, 128 }
 0x10a   :  { %p233_p7 = scmp.ne.s32.totalorder %s325_s3, %s232_s16  ;;  %p236_p8 = scmp.lt.u32.totalorder %s232_s16, %s325_s3 }
 0x10c   :  { %p238_p9 = pnand %p236_p8, %p233_p7 }
 0x10e   :  { %241 = shalt.err (!%p238_p9)
}
 0x10f   :  { %137 = dma.vmem_to_hbm [thread:$0]  %s135_s12, 128, %s325_s3, [#allocation4]  }
 0x110   :  { %246 = dma.done.wait [#allocation4], 128  }
 0x111   :  { %247 = vsyncadd [#allocation4], 4294967168 }
 0x112   :  { %141 = vsyncpa [#allocation3], 1 }
 0x113   :  { %142 = vsyncpa [#allocation6], 1 }
 0x114   :  { %143 = vsyncpa [#allocation4], 1 }

</bundles_post_ra>
